<compile_context>
chip_gen: v6e
topology: v6e:2x2x1
jax: 0.10.0
libtpu: 0.0.40
codegen_flags: <defaults>
</compile_context>

<pallas_src>
import math
import functools

import jax
import jax.numpy as jnp
from jax.experimental import pallas as pl
from jax.experimental.pallas import tpu as pltpu


def attention_fusion_kernel(
    base_ref,    # (1, TQ, H)   query-side features tile (also residual input)
    ms_ref,      # (1, Skv, H)  key/value-side features (compute_dtype)
    wq_t_ref,    # (H, H)       Wq^T
    wkv_t_ref,   # (H, 2H)      [Wk^T | Wv^T]
    bq_ref,      # (1, H)       f32
    bkv_ref,     # (1, 2H)      [bk | bv]  f32
    wo_t_ref,    # (H, H)       Wo^T
    bo_ref,      # (1, H)       f32
    gamma_ref,   # (1, H)       f32
    beta_ref,    # (1, H)       f32
    out_ref,     # (1, TQ, H)
    kv_ref,      # VMEM scratch (Skv, 2H)  compute_dtype  -- persists across qt tiles
    ctx_ref,     # VMEM scratch (TQ, H)    compute_dtype  -- concatenated head outputs
    *,
    num_heads: int,
    eps: float,
    compute_dtype,
):
    qt = pl.program_id(1)
    H = wq_t_ref.shape[0]
    hd = H // num_heads
    scale = 1.0 / math.sqrt(hd)
    cdt = compute_dtype

    # ---- K/V projection: once per batch element, cached across all query tiles ----
    @pl.when(qt == 0)
    def _():
        ms = ms_ref[0]                                                    # (Skv, H) cdt
        kv = jnp.dot(ms, wkv_t_ref[...],
                     preferred_element_type=jnp.float32) + bkv_ref[...]   # (Skv, 2H) f32
        kv_ref[...] = kv.astype(cdt)

    # ---- Q projection for this query tile (scale folded in once) ----
    base = base_ref[0]                                                    # (TQ, H)
    q = jnp.dot(base.astype(cdt), wq_t_ref[...],
                preferred_element_type=jnp.float32) + bq_ref[...]         # (TQ, H) f32
    q = (q * scale).astype(cdt)

    kv = kv_ref[...]
    k = kv[:, :H]                                                         # (Skv, H) cdt
    v = kv[:, H:]                                                         # (Skv, H) cdt

    # ---- per-head attention; head outputs concatenated into ctx scratch ----
    nt_dims = (((1,), (1,)), ((), ()))     # contract last dims (NT matmul, no kh.T)
    for h in range(num_heads):             # unrolled: small num_heads
        lo = h * hd
        qh = q[:, lo:lo + hd]              # (TQ, hd)
        kh = k[:, lo:lo + hd]              # (Skv, hd)
        vh = v[:, lo:lo + hd]              # (Skv, hd)

        s = jax.lax.dot_general(qh, kh, nt_dims,
                                preferred_element_type=jnp.float32)       # (TQ, Skv)
        s = s - jnp.max(s, axis=-1, keepdims=True)
        p = jnp.exp(s)
        row_sum = jnp.sum(p, axis=-1, keepdims=True)                      # (TQ, 1)
        oh = jnp.dot(p.astype(cdt), vh,
                     preferred_element_type=jnp.float32)                  # (TQ, hd)
        # Flash ordering: normalise the (TQ, hd) context, not the (TQ, Skv) probs.
        oh = oh * pl.reciprocal(row_sum, approx=True)
        ctx_ref[:, lo:lo + hd] = oh.astype(cdt)

    # ---- single K=H output projection on the concatenated heads ----
    attn_out = jnp.dot(ctx_ref[...], wo_t_ref[...],
                       preferred_element_type=jnp.float32) + bo_ref[...]  # (TQ, H) f32

    # ---- residual + LayerNorm (statistics in f32) ----
    fused = base.astype(jnp.float32) + attn_out
    inv_h = 1.0 / H
    mean = jnp.sum(fused, axis=-1, keepdims=True) * inv_h
    centered = fused - mean
    var = jnp.sum(centered * centered, axis=-1, keepdims=True) * inv_h
    normed = centered * jax.lax.rsqrt(var + eps)
    out_ref[0] = (normed * gamma_ref[...] + beta_ref[...]).astype(out_ref.dtype)


def _pick_q_tile(sq, desired):
    """Largest query tile <= desired that divides Sq and satisfies the sublane rule."""
    if desired >= sq:
        return sq
    t = (min(desired, sq) // 8) * 8
    while t >= 8:
        if sq % t == 0:
            return t
        t -= 8
    return sq


def _invariant_spec(shape):
    """Constant-index BlockSpec, single-buffered when supported."""
    idx = lambda b, qt, _n=len(shape): (0,) * _n
    try:
        return pl.BlockSpec(shape, idx, pipeline_mode=pl.Buffered(1))
    except Exception:  # older jax without pipeline_mode: fall back to defaults
        return pl.BlockSpec(shape, idx)


def attention_fusion(base_features, multi_scale_features, params, *,
                     num_heads, eps=1e-5, compute_dtype=None,
                     block_q=None, vmem_limit_bytes=None):
    """params = (wq, wk, wv, bq, bk, bv, wo, bo, gamma, beta) in PyTorch layout."""
    B, Sq, H = base_features.shape
    _, Skv, _ = multi_scale_features.shape
    assert H % num_heads == 0

    wq, wk, wv, bq, bk, bv, wo, bo, gamma, beta = params
    cdt = jnp.dtype(compute_dtype) if compute_dtype is not None else base_features.dtype

    # ---- generation-aware VMEM budget / query-tile size ----
    try:
        info = pltpu.get_tpu_info()
        vmem_cap = int(getattr(info, "vmem_capacity_bytes", 64 * 1024 * 1024))
    except Exception:
        vmem_cap = 64 * 1024 * 1024                     # conservative (v7x-sized) fallback
    if vmem_limit_bytes is None:
        vmem_limit_bytes = min((vmem_cap * 3) // 4, 100 * 1024 * 1024)
    if block_q is None:
        block_q = 256 if vmem_cap <= 64 * 1024 * 1024 else 512
    tq = _pick_q_tile(Sq, block_q)
    num_qt = Sq // tq

    # ---- host-side weight prep: transpose, fuse KV, cast MXU operands ----
    wq_t = wq.T.astype(cdt)                                    # (H, H)
    wkv_t = jnp.concatenate([wk.T, wv.T], axis=1).astype(cdt)  # (H, 2H)
    bkv = jnp.concatenate([bk, bv], axis=1)                    # (1, 2H) f32
    wo_t = wo.T.astype(cdt)                                    # (H, H)
    ms = multi_scale_features.astype(cdt)                      # cast once in HBM
    # base_features stays in its original dtype: it feeds the f32 residual path.

    kernel = functools.partial(attention_fusion_kernel,
                               num_heads=num_heads, eps=eps, compute_dtype=cdt)

    q_tile_spec = pl.BlockSpec((1, tq, H), lambda b, qt: (b, qt, 0))
    kv_full_spec = pl.BlockSpec((1, Skv, H), lambda b, qt: (b, 0, 0))

    return pl.pallas_call(
        kernel,
        out_shape=jax.ShapeDtypeStruct((B, Sq, H), base_features.dtype),
        grid_spec=pltpu.PrefetchScalarGridSpec(
            num_scalar_prefetch=0,
            grid=(B, num_qt),
            in_specs=[
                q_tile_spec,                        # base_features tile
                kv_full_spec,                       # multi_scale_features (per batch)
                _invariant_spec((H, H)),            # Wq^T
                _invariant_spec((H, 2 * H)),        # [Wk^T | Wv^T]
                _invariant_spec((1, H)),            # bq
                _invariant_spec((1, 2 * H)),        # [bk | bv]
                _invariant_spec((H, H)),            # Wo^T
                _invariant_spec((1, H)),            # bo
                _invariant_spec((1, H)),            # gamma
                _invariant_spec((1, H)),            # beta
            ],
            out_specs=q_tile_spec,
            scratch_shapes=[
                pltpu.VMEM((Skv, 2 * H), cdt),      # cached K/V projection
                pltpu.VMEM((tq, H), cdt),           # concatenated head outputs
            ],
        ),
        compiler_params=pltpu.CompilerParams(
            dimension_semantics=("parallel", "arbitrary"),
            vmem_limit_bytes=int(vmem_limit_bytes),
        ),
    )(base_features, ms, wq_t, wkv_t, bq, bkv, wo_t, bo, gamma, beta)


def _reference(base, ms, params, num_heads, eps=1e-5):
    """Plain-JAX reference mirroring nn.MultiheadAttention + residual + LayerNorm."""
    wq, wk, wv, bq, bk, bv, wo, bo, gamma, beta = params
    B, Sq, H = base.shape
    Skv = ms.shape[1]
    hd = H // num_heads
    q = base @ wq.T + bq[0]
    k = ms @ wk.T + bk[0]
    v = ms @ wv.T + bv[0]
    q = q.reshape(B, Sq, num_heads, hd).transpose(0, 2, 1, 3)
    k = k.reshape(B, Skv, num_heads, hd).transpose(0, 2, 1, 3)
    v = v.reshape(B, Skv, num_heads, hd).transpose(0, 2, 1, 3)
    s = jnp.einsum("bhqd,bhkd->bhqk", q, k) / math.sqrt(hd)
    p = jax.nn.softmax(s, axis=-1)
    o = jnp.einsum("bhqk,bhkd->bhqd", p, v).transpose(0, 2, 1, 3).reshape(B, Sq, H)
    attn_out = o @ wo.T + bo[0]
    fused = base + attn_out
    mean = fused.mean(-1, keepdims=True)
    var = ((fused - mean) ** 2).mean(-1, keepdims=True)
    return (fused - mean) * jax.lax.rsqrt(var + eps) * gamma[0] + beta[0]


if __name__ == "__main__":
    # Small shapes consistent with the module's forward pass. Sq=16 with block_q=8
    # exercises the query-tile axis (2 tiles) and the cached-KV reuse path.
    B, Sq, Skv, H, NH = 2, 16, 16, 32, 4

    key = jax.random.PRNGKey(0)
    keys = jax.random.split(key, 8)

    base = jax.random.normal(keys[0], (B, Sq, H), dtype=jnp.float32)
    ms = jax.random.normal(keys[1], (B, Skv, H), dtype=jnp.float32)

    # Deterministic synthetic parameters (shapes from nn.MultiheadAttention / nn.LayerNorm).
    in_proj_w = jax.random.normal(keys[2], (3 * H, H), dtype=jnp.float32) * (1.0 / math.sqrt(H))
    in_proj_b = jax.random.normal(keys[3], (3 * H,), dtype=jnp.float32) * 0.02
    wq, wk, wv = in_proj_w[:H], in_proj_w[H:2 * H], in_proj_w[2 * H:]
    bq, bk, bv = (in_proj_b[:H].reshape(1, H),
                  in_proj_b[H:2 * H].reshape(1, H),
                  in_proj_b[2 * H:].reshape(1, H))
    wo = jax.random.normal(keys[4], (H, H), dtype=jnp.float32) * (1.0 / math.sqrt(H))
    bo = (jax.random.normal(keys[5], (H,), dtype=jnp.float32) * 0.02).reshape(1, H)
    gamma = jnp.ones((1, H), dtype=jnp.float32)
    beta = jnp.zeros((1, H), dtype=jnp.float32)

    params = (wq, wk, wv, bq, bk, bv, wo, bo, gamma, beta)
    ref = _reference(base, ms, params, NH)

    # f32 compute path (tolerance accounts for the approximate EUP reciprocal).
    out = attention_fusion(base, ms, params, num_heads=NH, block_q=8)
    out = jax.block_until_ready(out)
    assert jnp.allclose(out, ref, atol=2e-3, rtol=2e-3), "f32 mismatch vs reference"

    # bf16 MXU-operand path (f32 softmax/LN stats) — looser tolerance for bf16 rounding.
    out_bf16 = attention_fusion(base, ms, params, num_heads=NH,
                                compute_dtype=jnp.bfloat16, block_q=8)
    out_bf16 = jax.block_until_ready(out_bf16)
    assert jnp.allclose(out_bf16, ref, atol=1e-1, rtol=1e-1), "bf16 mismatch vs reference"

    print("KERNEL_OK")
</pallas_src>

<mosaic_0001>
module attributes {stable_mosaic.version = 11 : i64} {
  func.func @attention_fusion_kernel(%arg0: i32, %arg1: i32, %arg2: memref<1x8x32xf32, #tpu.memory_space<vmem>>, %arg3: memref<1x16x32xf32, #tpu.memory_space<vmem>>, %arg4: memref<32x32xf32, #tpu.memory_space<vmem>>, %arg5: memref<32x64xf32, #tpu.memory_space<vmem>>, %arg6: memref<1x32xf32, #tpu.memory_space<vmem>>, %arg7: memref<1x64xf32, #tpu.memory_space<vmem>>, %arg8: memref<32x32xf32, #tpu.memory_space<vmem>>, %arg9: memref<1x32xf32, #tpu.memory_space<vmem>>, %arg10: memref<1x32xf32, #tpu.memory_space<vmem>>, %arg11: memref<1x32xf32, #tpu.memory_space<vmem>>, %arg12: memref<1x8x32xf32, #tpu.memory_space<vmem>>, %arg13: memref<16x64xf32, #tpu.memory_space<vmem>>, %arg14: memref<8x32xf32, #tpu.memory_space<vmem>>) attributes {dimension_semantics = [#tpu.dimension_semantics<parallel>, #tpu.dimension_semantics<arbitrary>], iteration_bounds = array<i64: 2, 2>, scalar_prefetch = 0 : i64, scratch_operands = 2 : i64, tpu.core_type = #tpu.core_type<tc>, window_params = [{transform_indices = @transform_0, window_bounds = array<i64: 1, 8, 32>}, {transform_indices = @transform_1, window_bounds = array<i64: 1, 16, 32>}, {pipeline_mode = #tpu.pipeline_mode<synchronous>, transform_indices = @transform_2, window_bounds = array<i64: 32, 32>}, {pipeline_mode = #tpu.pipeline_mode<synchronous>, transform_indices = @transform_3, window_bounds = array<i64: 32, 64>}, {pipeline_mode = #tpu.pipeline_mode<synchronous>, transform_indices = @transform_4, window_bounds = array<i64: 1, 32>}, {pipeline_mode = #tpu.pipeline_mode<synchronous>, transform_indices = @transform_5, window_bounds = array<i64: 1, 64>}, {pipeline_mode = #tpu.pipeline_mode<synchronous>, transform_indices = @transform_6, window_bounds = array<i64: 32, 32>}, {pipeline_mode = #tpu.pipeline_mode<synchronous>, transform_indices = @transform_7, window_bounds = array<i64: 1, 32>}, {pipeline_mode = #tpu.pipeline_mode<synchronous>, transform_indices = @transform_8, window_bounds = array<i64: 1, 32>}, {pipeline_mode = #tpu.pipeline_mode<synchronous>, transform_indices = @transform_9, window_bounds = array<i64: 1, 32>}, {transform_indices = @transform_10, window_bounds = array<i64: 1, 8, 32>}]} {
    %c0_i32 = arith.constant 0 : i32
    %0 = arith.cmpi eq, %arg1, %c0_i32 : i32
    %1 = arith.extui %0 : i1 to i32
    %c0_i32_0 = arith.constant 0 : i32
    %2 = arith.cmpi ne, %1, %c0_i32_0 : i32
    scf.if %2 {
      %c0_50 = arith.constant 0 : index
      %c0_51 = arith.constant 0 : index
      %c0_52 = arith.constant 0 : index
      %111 = vector.load %arg3[%c0_50, %c0_51, %c0_52] : memref<1x16x32xf32, #tpu.memory_space<vmem>>, vector<1x16x32xf32>
      %112 = vector.shape_cast %111 : vector<1x16x32xf32> to vector<16x32xf32>
      %c0_53 = arith.constant 0 : index
      %c0_54 = arith.constant 0 : index
      %113 = vector.load %arg5[%c0_53, %c0_54] : memref<32x64xf32, #tpu.memory_space<vmem>>, vector<32x64xf32>
      %cst_55 = arith.constant dense<0.000000e+00> : vector<16x64xf32>
      %114 = tpu.matmul %112, %113, %cst_55 {dimension_numbers = #tpu.dot_dimension_numbers<[1], [0], [0], [1], [0, 0, 1, 1], [], []>} : vector<16x32xf32>, vector<32x64xf32>, vector<16x64xf32> -> vector<16x64xf32>
      %c0_56 = arith.constant 0 : index
      %c0_57 = arith.constant 0 : index
      %115 = vector.load %arg7[%c0_56, %c0_57] : memref<1x64xf32, #tpu.memory_space<vmem>>, vector<1x64xf32>
      %116 = vector.broadcast %115 : vector<1x64xf32> to vector<16x64xf32>
      %117 = arith.addf %114, %116 : vector<16x64xf32>
      %c0_58 = arith.constant 0 : index
      %c0_59 = arith.constant 0 : index
      %118 = vector.load %arg13[%c0_58, %c0_59] : memref<16x64xf32, #tpu.memory_space<vmem>>, vector<16x64xf32>
      tpu.vector_store %arg13[%c0_58, %c0_59], %117 {strides = array<i32>} : memref<16x64xf32, #tpu.memory_space<vmem>>, vector<16x64xf32>,
    } else {
    }
    %c0 = arith.constant 0 : index
    %c0_1 = arith.constant 0 : index
    %c0_2 = arith.constant 0 : index
    %3 = vector.load %arg2[%c0, %c0_1, %c0_2] : memref<1x8x32xf32, #tpu.memory_space<vmem>>, vector<1x8x32xf32>
    %4 = vector.shape_cast %3 : vector<1x8x32xf32> to vector<8x32xf32>
    %c0_3 = arith.constant 0 : index
    %c0_4 = arith.constant 0 : index
    %5 = vector.load %arg4[%c0_3, %c0_4] : memref<32x32xf32, #tpu.memory_space<vmem>>, vector<32x32xf32>
    %cst = arith.constant dense<0.000000e+00> : vector<8x32xf32>
    %6 = tpu.matmul %4, %5, %cst {dimension_numbers = #tpu.dot_dimension_numbers<[1], [0], [0], [1], [0, 0, 1, 1], [], []>} : vector<8x32xf32>, vector<32x32xf32>, vector<8x32xf32> -> vector<8x32xf32>
    %c0_5 = arith.constant 0 : index
    %c0_6 = arith.constant 0 : index
    %7 = vector.load %arg6[%c0_5, %c0_6] : memref<1x32xf32, #tpu.memory_space<vmem>>, vector<1x32xf32>
    %8 = vector.broadcast %7 : vector<1x32xf32> to vector<8x32xf32>
    %9 = arith.addf %6, %8 : vector<8x32xf32>
    %cst_7 = arith.constant 0.353553385 : f32
    %10 = vector.broadcast %cst_7 : f32 to vector<8x32xf32>
    %11 = arith.mulf %9, %10 : vector<8x32xf32>
    %c0_8 = arith.constant 0 : index
    %c0_9 = arith.constant 0 : index
    %12 = vector.load %arg13[%c0_8, %c0_9] : memref<16x64xf32, #tpu.memory_space<vmem>>, vector<16x64xf32>
    %13 = vector.extract_strided_slice %12 {offsets = [0, 0], sizes = [16, 32], strides = [1, 1]} : vector<16x64xf32> to vector<16x32xf32>
    %14 = vector.extract_strided_slice %12 {offsets = [0, 32], sizes = [16, 32], strides = [1, 1]} : vector<16x64xf32> to vector<16x32xf32>
    %15 = vector.extract_strided_slice %11 {offsets = [0, 0], sizes = [8, 8], strides = [1, 1]} : vector<8x32xf32> to vector<8x8xf32>
    %16 = vector.extract_strided_slice %13 {offsets = [0, 0], sizes = [16, 8], strides = [1, 1]} : vector<16x32xf32> to vector<16x8xf32>
    %17 = vector.extract_strided_slice %14 {offsets = [0, 0], sizes = [16, 8], strides = [1, 1]} : vector<16x32xf32> to vector<16x8xf32>
    %cst_10 = arith.constant dense<0.000000e+00> : vector<8x16xf32>
    %18 = tpu.matmul %15, %16, %cst_10 {dimension_numbers = #tpu.dot_dimension_numbers<[1], [1], [0], [0], [0, 0, 1, 0], [], []>} : vector<8x8xf32>, vector<16x8xf32>, vector<8x16xf32> -> vector<8x16xf32>
    %cst_11 = arith.constant dense<0xFF800000> : vector<8xf32>
    %19 = vector.multi_reduction <maximumf>, %18, %cst_11 [1] : vector<8x16xf32> to vector<8xf32>
    %20 = vector.shape_cast %19 : vector<8xf32> to vector<8x1xf32>
    %21 = vector.broadcast %20 : vector<8x1xf32> to vector<8x16xf32>
    %22 = arith.subf %18, %21 : vector<8x16xf32>
    %23 = math.exp %22 : vector<8x16xf32>
    %cst_12 = arith.constant dense<0.000000e+00> : vector<8xf32>
    %24 = vector.multi_reduction <add>, %23, %cst_12 [1] : vector<8x16xf32> to vector<8xf32>
    %25 = vector.shape_cast %24 : vector<8xf32> to vector<8x1xf32>
    %cst_13 = arith.constant dense<0.000000e+00> : vector<8x8xf32>
    %26 = tpu.matmul %23, %17, %cst_13 {dimension_numbers = #tpu.dot_dimension_numbers<[1], [0], [0], [1], [0, 0, 1, 1], [], []>} : vector<8x16xf32>, vector<16x8xf32>, vector<8x8xf32> -> vector<8x8xf32>
    %27 = tpu.reciprocal %25 {approx = true} : vector<8x1xf32> -> vector<8x1xf32>
    %28 = vector.broadcast %27 : vector<8x1xf32> to vector<8x8xf32>
    %29 = arith.mulf %26, %28 : vector<8x8xf32>
    %c0_14 = arith.constant 0 : index
    %c0_15 = arith.constant 0 : index
    %30 = vector.load %arg14[%c0_14, %c0_15] : memref<8x32xf32, #tpu.memory_space<vmem>>, vector<8x8xf32>
    tpu.vector_store %arg14[%c0_14, %c0_15], %29 {strides = array<i32>} : memref<8x32xf32, #tpu.memory_space<vmem>>, vector<8x8xf32>,
    %31 = vector.extract_strided_slice %11 {offsets = [0, 8], sizes = [8, 8], strides = [1, 1]} : vector<8x32xf32> to vector<8x8xf32>
    %32 = vector.extract_strided_slice %13 {offsets = [0, 8], sizes = [16, 8], strides = [1, 1]} : vector<16x32xf32> to vector<16x8xf32>
    %33 = vector.extract_strided_slice %14 {offsets = [0, 8], sizes = [16, 8], strides = [1, 1]} : vector<16x32xf32> to vector<16x8xf32>
    %cst_16 = arith.constant dense<0.000000e+00> : vector<8x16xf32>
    %34 = tpu.matmul %31, %32, %cst_16 {dimension_numbers = #tpu.dot_dimension_numbers<[1], [1], [0], [0], [0, 0, 1, 0], [], []>} : vector<8x8xf32>, vector<16x8xf32>, vector<8x16xf32> -> vector<8x16xf32>
    %cst_17 = arith.constant dense<0xFF800000> : vector<8xf32>
    %35 = vector.multi_reduction <maximumf>, %34, %cst_17 [1] : vector<8x16xf32> to vector<8xf32>
    %36 = vector.shape_cast %35 : vector<8xf32> to vector<8x1xf32>
    %37 = vector.broadcast %36 : vector<8x1xf32> to vector<8x16xf32>
    %38 = arith.subf %34, %37 : vector<8x16xf32>
    %39 = math.exp %38 : vector<8x16xf32>
    %cst_18 = arith.constant dense<0.000000e+00> : vector<8xf32>
    %40 = vector.multi_reduction <add>, %39, %cst_18 [1] : vector<8x16xf32> to vector<8xf32>
    %41 = vector.shape_cast %40 : vector<8xf32> to vector<8x1xf32>
    %cst_19 = arith.constant dense<0.000000e+00> : vector<8x8xf32>
    %42 = tpu.matmul %39, %33, %cst_19 {dimension_numbers = #tpu.dot_dimension_numbers<[1], [0], [0], [1], [0, 0, 1, 1], [], []>} : vector<8x16xf32>, vector<16x8xf32>, vector<8x8xf32> -> vector<8x8xf32>
    %43 = tpu.reciprocal %41 {approx = true} : vector<8x1xf32> -> vector<8x1xf32>
    %44 = vector.broadcast %43 : vector<8x1xf32> to vector<8x8xf32>
    %45 = arith.mulf %42, %44 : vector<8x8xf32>
    %c0_20 = arith.constant 0 : index
    %c8 = arith.constant 8 : index
    %46 = vector.load %arg14[%c0_20, %c8] : memref<8x32xf32, #tpu.memory_space<vmem>>, vector<8x8xf32>
    tpu.vector_store %arg14[%c0_20, %c8], %45 {strides = array<i32>} : memref<8x32xf32, #tpu.memory_space<vmem>>, vector<8x8xf32>,
    %47 = vector.extract_strided_slice %11 {offsets = [0, 16], sizes = [8, 8], strides = [1, 1]} : vector<8x32xf32> to vector<8x8xf32>
    %48 = vector.extract_strided_slice %13 {offsets = [0, 16], sizes = [16, 8], strides = [1, 1]} : vector<16x32xf32> to vector<16x8xf32>
    %49 = vector.extract_strided_slice %14 {offsets = [0, 16], sizes = [16, 8], strides = [1, 1]} : vector<16x32xf32> to vector<16x8xf32>
    %cst_21 = arith.constant dense<0.000000e+00> : vector<8x16xf32>
    %50 = tpu.matmul %47, %48, %cst_21 {dimension_numbers = #tpu.dot_dimension_numbers<[1], [1], [0], [0], [0, 0, 1, 0], [], []>} : vector<8x8xf32>, vector<16x8xf32>, vector<8x16xf32> -> vector<8x16xf32>
    %cst_22 = arith.constant dense<0xFF800000> : vector<8xf32>
    %51 = vector.multi_reduction <maximumf>, %50, %cst_22 [1] : vector<8x16xf32> to vector<8xf32>
    %52 = vector.shape_cast %51 : vector<8xf32> to vector<8x1xf32>
    %53 = vector.broadcast %52 : vector<8x1xf32> to vector<8x16xf32>
    %54 = arith.subf %50, %53 : vector<8x16xf32>
    %55 = math.exp %54 : vector<8x16xf32>
    %cst_23 = arith.constant dense<0.000000e+00> : vector<8xf32>
    %56 = vector.multi_reduction <add>, %55, %cst_23 [1] : vector<8x16xf32> to vector<8xf32>
    %57 = vector.shape_cast %56 : vector<8xf32> to vector<8x1xf32>
    %cst_24 = arith.constant dense<0.000000e+00> : vector<8x8xf32>
    %58 = tpu.matmul %55, %49, %cst_24 {dimension_numbers = #tpu.dot_dimension_numbers<[1], [0], [0], [1], [0, 0, 1, 1], [], []>} : vector<8x16xf32>, vector<16x8xf32>, vector<8x8xf32> -> vector<8x8xf32>
    %59 = tpu.reciprocal %57 {approx = true} : vector<8x1xf32> -> vector<8x1xf32>
    %60 = vector.broadcast %59 : vector<8x1xf32> to vector<8x8xf32>
    %61 = arith.mulf %58, %60 : vector<8x8xf32>
    %c0_25 = arith.constant 0 : index
    %c16 = arith.constant 16 : index
    %62 = vector.load %arg14[%c0_25, %c16] : memref<8x32xf32, #tpu.memory_space<vmem>>, vector<8x8xf32>
    tpu.vector_store %arg14[%c0_25, %c16], %61 {strides = array<i32>} : memref<8x32xf32, #tpu.memory_space<vmem>>, vector<8x8xf32>,
    %63 = vector.extract_strided_slice %11 {offsets = [0, 24], sizes = [8, 8], strides = [1, 1]} : vector<8x32xf32> to vector<8x8xf32>
    %64 = vector.extract_strided_slice %13 {offsets = [0, 24], sizes = [16, 8], strides = [1, 1]} : vector<16x32xf32> to vector<16x8xf32>
    %65 = vector.extract_strided_slice %14 {offsets = [0, 24], sizes = [16, 8], strides = [1, 1]} : vector<16x32xf32> to vector<16x8xf32>
    %cst_26 = arith.constant dense<0.000000e+00> : vector<8x16xf32>
    %66 = tpu.matmul %63, %64, %cst_26 {dimension_numbers = #tpu.dot_dimension_numbers<[1], [1], [0], [0], [0, 0, 1, 0], [], []>} : vector<8x8xf32>, vector<16x8xf32>, vector<8x16xf32> -> vector<8x16xf32>
    %cst_27 = arith.constant dense<0xFF800000> : vector<8xf32>
    %67 = vector.multi_reduction <maximumf>, %66, %cst_27 [1] : vector<8x16xf32> to vector<8xf32>
    %68 = vector.shape_cast %67 : vector<8xf32> to vector<8x1xf32>
    %69 = vector.broadcast %68 : vector<8x1xf32> to vector<8x16xf32>
    %70 = arith.subf %66, %69 : vector<8x16xf32>
    %71 = math.exp %70 : vector<8x16xf32>
    %cst_28 = arith.constant dense<0.000000e+00> : vector<8xf32>
    %72 = vector.multi_reduction <add>, %71, %cst_28 [1] : vector<8x16xf32> to vector<8xf32>
    %73 = vector.shape_cast %72 : vector<8xf32> to vector<8x1xf32>
    %cst_29 = arith.constant dense<0.000000e+00> : vector<8x8xf32>
    %74 = tpu.matmul %71, %65, %cst_29 {dimension_numbers = #tpu.dot_dimension_numbers<[1], [0], [0], [1], [0, 0, 1, 1], [], []>} : vector<8x16xf32>, vector<16x8xf32>, vector<8x8xf32> -> vector<8x8xf32>
    %75 = tpu.reciprocal %73 {approx = true} : vector<8x1xf32> -> vector<8x1xf32>
    %76 = vector.broadcast %75 : vector<8x1xf32> to vector<8x8xf32>
    %77 = arith.mulf %74, %76 : vector<8x8xf32>
    %c0_30 = arith.constant 0 : index
    %c24 = arith.constant 24 : index
    %78 = vector.load %arg14[%c0_30, %c24] : memref<8x32xf32, #tpu.memory_space<vmem>>, vector<8x8xf32>
    tpu.vector_store %arg14[%c0_30, %c24], %77 {strides = array<i32>} : memref<8x32xf32, #tpu.memory_space<vmem>>, vector<8x8xf32>,
    %c0_31 = arith.constant 0 : index
    %c0_32 = arith.constant 0 : index
    %79 = vector.load %arg14[%c0_31, %c0_32] : memref<8x32xf32, #tpu.memory_space<vmem>>, vector<8x32xf32>
    %c0_33 = arith.constant 0 : index
    %c0_34 = arith.constant 0 : index
    %80 = vector.load %arg8[%c0_33, %c0_34] : memref<32x32xf32, #tpu.memory_space<vmem>>, vector<32x32xf32>
    %cst_35 = arith.constant dense<0.000000e+00> : vector<8x32xf32>
    %81 = tpu.matmul %79, %80, %cst_35 {dimension_numbers = #tpu.dot_dimension_numbers<[1], [0], [0], [1], [0, 0, 1, 1], [], []>} : vector<8x32xf32>, vector<32x32xf32>, vector<8x32xf32> -> vector<8x32xf32>
    %c0_36 = arith.constant 0 : index
    %c0_37 = arith.constant 0 : index
    %82 = vector.load %arg9[%c0_36, %c0_37] : memref<1x32xf32, #tpu.memory_space<vmem>>, vector<1x32xf32>
    %83 = vector.broadcast %82 : vector<1x32xf32> to vector<8x32xf32>
    %84 = arith.addf %81, %83 : vector<8x32xf32>
    %85 = arith.addf %4, %84 : vector<8x32xf32>
    %cst_38 = arith.constant dense<0.000000e+00> : vector<8xf32>
    %86 = vector.multi_reduction <add>, %85, %cst_38 [1] : vector<8x32xf32> to vector<8xf32>
    %87 = vector.shape_cast %86 : vector<8xf32> to vector<8x1xf32>
    %cst_39 = arith.constant 3.125000e-02 : f32
    %88 = vector.broadcast %cst_39 : f32 to vector<8x1xf32>
    %89 = arith.mulf %87, %88 : vector<8x1xf32>
    %90 = vector.broadcast %89 : vector<8x1xf32> to vector<8x32xf32>
    %91 = arith.subf %85, %90 : vector<8x32xf32>
    %92 = arith.mulf %91, %91 : vector<8x32xf32>
    %cst_40 = arith.constant dense<0.000000e+00> : vector<8xf32>
    %93 = vector.multi_reduction <add>, %92, %cst_40 [1] : vector<8x32xf32> to vector<8xf32>
    %94 = vector.shape_cast %93 : vector<8xf32> to vector<8x1xf32>
    %cst_41 = arith.constant 3.125000e-02 : f32
    %95 = vector.broadcast %cst_41 : f32 to vector<8x1xf32>
    %96 = arith.mulf %94, %95 : vector<8x1xf32>
    %cst_42 = arith.constant 9.99999974E-6 : f32
    %97 = vector.broadcast %cst_42 : f32 to vector<8x1xf32>
    %98 = arith.addf %96, %97 : vector<8x1xf32>
    %99 = math.rsqrt %98 : vector<8x1xf32>
    %100 = vector.broadcast %99 : vector<8x1xf32> to vector<8x32xf32>
    %101 = arith.mulf %91, %100 : vector<8x32xf32>
    %c0_43 = arith.constant 0 : index
    %c0_44 = arith.constant 0 : index
    %102 = vector.load %arg10[%c0_43, %c0_44] : memref<1x32xf32, #tpu.memory_space<vmem>>, vector<1x32xf32>
    %103 = vector.broadcast %102 : vector<1x32xf32> to vector<8x32xf32>
    %104 = arith.mulf %101, %103 : vector<8x32xf32>
    %c0_45 = arith.constant 0 : index
    %c0_46 = arith.constant 0 : index
    %105 = vector.load %arg11[%c0_45, %c0_46] : memref<1x32xf32, #tpu.memory_space<vmem>>, vector<1x32xf32>
    %106 = vector.broadcast %105 : vector<1x32xf32> to vector<8x32xf32>
    %107 = arith.addf %104, %106 : vector<8x32xf32>
    %c0_47 = arith.constant 0 : index
    %c0_48 = arith.constant 0 : index
    %c0_49 = arith.constant 0 : index
    %108 = vector.load %arg12[%c0_47, %c0_48, %c0_49] : memref<1x8x32xf32, #tpu.memory_space<vmem>>, vector<1x8x32xf32>
    %109 = vector.shape_cast %108 : vector<1x8x32xf32> to vector<8x32xf32>
    %110 = vector.shape_cast %107 : vector<8x32xf32> to vector<1x8x32xf32>
    tpu.vector_store %arg12[%c0_47, %c0_48, %c0_49], %110 {strides = array<i32>} : memref<1x8x32xf32, #tpu.memory_space<vmem>>, vector<1x8x32xf32>,
    return
  }
  func.func @transform_0(%arg0: i32, %arg1: i32) -> (i32, i32, i32) {
    %c0_i32 = arith.constant 0 : i32
    %c0_i32_0 = arith.constant 0 : i32
    return %arg0, %arg1, %c0_i32 : i32, i32, i32
  }
  func.func @transform_1(%arg0: i32, %arg1: i32) -> (i32, i32, i32) {
    %c0_i32 = arith.constant 0 : i32
    %c0_i32_0 = arith.constant 0 : i32
    %c0_i32_1 = arith.constant 0 : i32
    return %arg0, %c0_i32, %c0_i32_0 : i32, i32, i32
  }
  func.func @transform_2(%arg0: i32, %arg1: i32) -> (i32, i32) {
    %c0_i32 = arith.constant 0 : i32
    %c0_i32_0 = arith.constant 0 : i32
    %c0_i32_1 = arith.constant 0 : i32
    return %c0_i32, %c0_i32_0 : i32, i32
  }
  func.func @transform_3(%arg0: i32, %arg1: i32) -> (i32, i32) {
    %c0_i32 = arith.constant 0 : i32
    %c0_i32_0 = arith.constant 0 : i32
    %c0_i32_1 = arith.constant 0 : i32
    return %c0_i32, %c0_i32_0 : i32, i32
  }
  func.func @transform_4(%arg0: i32, %arg1: i32) -> (i32, i32) {
    %c0_i32 = arith.constant 0 : i32
    %c0_i32_0 = arith.constant 0 : i32
    %c0_i32_1 = arith.constant 0 : i32
    return %c0_i32, %c0_i32_0 : i32, i32
  }
  func.func @transform_5(%arg0: i32, %arg1: i32) -> (i32, i32) {
    %c0_i32 = arith.constant 0 : i32
    %c0_i32_0 = arith.constant 0 : i32
    %c0_i32_1 = arith.constant 0 : i32
    return %c0_i32, %c0_i32_0 : i32, i32
  }
  func.func @transform_6(%arg0: i32, %arg1: i32) -> (i32, i32) {
    %c0_i32 = arith.constant 0 : i32
    %c0_i32_0 = arith.constant 0 : i32
    %c0_i32_1 = arith.constant 0 : i32
    return %c0_i32, %c0_i32_0 : i32, i32
  }
  func.func @transform_7(%arg0: i32, %arg1: i32) -> (i32, i32) {
    %c0_i32 = arith.constant 0 : i32
    %c0_i32_0 = arith.constant 0 : i32
    %c0_i32_1 = arith.constant 0 : i32
    return %c0_i32, %c0_i32_0 : i32, i32
  }
  func.func @transform_8(%arg0: i32, %arg1: i32) -> (i32, i32) {
    %c0_i32 = arith.constant 0 : i32
    %c0_i32_0 = arith.constant 0 : i32
    %c0_i32_1 = arith.constant 0 : i32
    return %c0_i32, %c0_i32_0 : i32, i32
  }
  func.func @transform_9(%arg0: i32, %arg1: i32) -> (i32, i32) {
    %c0_i32 = arith.constant 0 : i32
    %c0_i32_0 = arith.constant 0 : i32
    %c0_i32_1 = arith.constant 0 : i32
    return %c0_i32, %c0_i32_0 : i32, i32
  }
  func.func @transform_10(%arg0: i32, %arg1: i32) -> (i32, i32, i32) {
    %c0_i32 = arith.constant 0 : i32
    %c0_i32_0 = arith.constant 0 : i32
    return %arg0, %arg1, %c0_i32 : i32, i32, i32
  }
}

</mosaic_0001>

<bundles_post_ra>
// kernel: tpu_custom_call.1
= control target key start
LH: loop header
LB: loop body
LE: loop exit
PB: predicated region body
PF: predicated region fallthrough
CT: control target
= control target key end

     0   :  { %s2759_s0 = inlined_call_operand.hbm [shape: f32[2,16,32], index: 0, kind: input, shape index: {}]   ;;  %s2760_s1 = inlined_call_operand.hbm [shape: f32[2,16,32], index: 1, kind: input, shape index: {}]   ;;  %s2761_s2 = inlined_call_operand.hbm [shape: f32[32,32], index: 2, kind: input, shape index: {}]   ;;  %s2762_s3 = inlined_call_operand.hbm [shape: f32[32,64], index: 3, kind: input, shape index: {}]   ;;  %s2763_s4 = inlined_call_operand.vmem [shape: f32[1,32], index: 4, kind: input, shape index: {}]   ;;  %s2764_s5 = inlined_call_operand.vmem [shape: f32[1,64], index: 5, kind: input, shape index: {}]   ;;  %s2765_s6 = inlined_call_operand.hbm [shape: f32[32,32], index: 6, kind: input, shape index: {}]   ;;  %s2766_s7 = inlined_call_operand.vmem [shape: f32[1,32], index: 7, kind: input, shape index: {}]   ;;  %s2767_s8 = inlined_call_operand.vmem [shape: f32[1,32], index: 8, kind: input, shape index: {}]   ;;  %s2768_s9 = inlined_call_operand.vmem [shape: f32[1,32], index: 9, kind: input, shape index: {}]   ;;  %s2769_s10 = inlined_call_operand.hbm [shape: f32[2,16,32], index: 10, kind: output, shape index: {}]  }
   0x1   :  { %2781 = sst [smem:[#allocation26_spill]] %s2759_s0 }
   0x2   :  { %2782 = sst [smem:[#allocation27_spill]] %s2761_s2 }
   0x3   :  { %2783 = sst [smem:[#allocation28_spill]] %s2762_s3 }
   0x4   :  { %2784 = sst [smem:[#allocation29_spill]] %s2763_s4 }
   0x5   :  { %2785 = sst [smem:[#allocation30_spill]] %s2764_s5 }
   0x6   :  { %2786 = sst [smem:[#allocation31_spill]] %s2765_s6 }
   0x7   :  { %2787 = sst [smem:[#allocation32_spill]] %s2766_s7 }
   0x8   :  { %2788 = sst [smem:[#allocation33_spill]] %s2767_s8 }
   0x9   :  { %2789 = sst [smem:[#allocation34_spill]] %s2768_s9 }
   0xa   :  { %2790 = sst [smem:[#allocation35_spill]] %s2769_s10 }
   0xb   :  { %15 = vsyncpa [#allocation5], 0 }
   0xc   :  { %17 = vsyncpa [#allocation5 + $0x1], 0 }
   0xd   :  { %18 = vsyncpa [#allocation8], 0 }
   0xe   :  { %20 = vsyncpa [#allocation8 + $0x1], 0 }
   0xf   :  { %21 = vsyncpa [#allocation11], 0 }
  0x10   :  { %22 = vsyncpa [#allocation6], 0 }
  0x11   :  { %24 = vsyncpa [#allocation6 + $0x1], 0  ;;  %s2335_s13 = smov 0   ;;  %s2337_s14 = smov 0  }
  0x12   :  { %s2339_s15 = smov 0   ;;  %s2341_s16 = smov 0  }
  0x13   :  { %s2343_s17 = smov 0   ;;  %s2345_s18 = smov 0  }
  0x14   :  { %s2347_s19 = smov 0   ;;  %s2349_s20 = smov 0  }
  0x15   :  { %s2351_s21 = smov 0   ;;  %s2353_s22 = smov 0  }
  0x16   :  { %s2355_s23 = smov 0  }
  0x17 LB: > { %2791 = sst [smem:[#allocation19_spill]] %s2246_s20  ;;  %s2389_s24 = sadd.s32 4294967295, %s2258_s23   ;;  %s2258_s23 = sphi %s2355_s23, %s30_s23   ;;  %s2254_s22 = sphi %s2353_s22, %s2841_s22   ;;  %s2250_s21 = sphi %s2351_s21, %s2832_s21   ;;  %s2246_s20 = sphi %s2349_s20, %s2840_s20   ;;  %s2242_s19 = sphi %s2347_s19, %s2831_s19   ;;  %s2238_s18 = sphi %s2345_s18, %s2839_s18   ;;  %s2234_s17 = sphi %s2343_s17, %s2838_s17   ;;  %s2230_s16 = sphi %s2341_s16, %s2837_s16   ;;  %s2226_s15 = sphi %s2339_s15, %s2836_s15   ;;  %s2222_s14 = sphi %s2337_s14, %s2835_s14   ;;  %s2218_s13 = sphi %s2335_s13, %s2834_s13  }
  0x18   : > { %2792 = sst [smem:[#allocation20_spill]] %s2250_s21  ;;  %p90_p0 = scmp.ne.s32.totalorder %s2222_s14, %s2218_s13 }
  0x19   : > { %p2775_p1 = scmp.eq.s32.totalorder %s2389_s24, 0  ;;  %p1643_p2 = scmp.ge.s32.totalorder %s2258_s23, 1 }
  0x1a   : > { %p297_p3 = scmp.lt.s32.totalorder %s2258_s23, 5  ;;  %s2260_s27 = smov [#allocation9]  }
  0x1b   : > { %p2397_p4 = por %p90_p0, %p2775_p1  ;;  %s309_s28 = sshll.u32 %s2260_s27, 4  ;;  %s310_s28 = int_to_ptr.vmem [resolvable:$true] %s309_s28 }
  0x1c   : > { %p2401_p5 = pnand %p1643_p2, %p297_p3  ;;  %s2261_s30 = smov [#allocation10]  }
  0x1d   : > { %s2793_s25 = scalar_select %p2397_p4, 1, 0 }
  0x1e   : > { %p1840_p6 = pneg %p2401_p5  ;;  %s322_s11 = sshll.u32 %s2261_s30, 4  ;;  %s323_s11 = int_to_ptr.vmem [resolvable:$true] %s322_s11 }
  0x1f   : > { %s2262_s12 = smov [#allocation12]   ;;  %s2003_s10 = scalar_lea.vmem %s310_s28, 512 }
  0x20   : > { %p2409_p7 = pnand %p1840_p6, %p2775_p1  ;;  %s341_s13 = sshll.u32 %s2262_s12, 4  ;;  %s342_s13 = int_to_ptr.vmem [resolvable:$true] %s341_s13 }
  0x21   : > { %p2004_p9 = scmp.ne.s32.totalorder %s310_s28, %s2003_s10  ;;  %p2011_p12 = scmp.lt.s32.totalorder %s310_s28, %s310_s28 }
  0x22   : > { %p1994_p8 = pneg %p2409_p7  ;;  %p2012_p13 = scmp.lt.s32.totalorder %s2003_s10, %s2003_s10 }
  0x24   : > { %p2006_p10 = pnand %p2004_p9, %p1994_p8  ;;  %p2013_p0 = por %p2012_p13, %p2011_p12 }
  0x26   : > { %p2007_p11 = pneg %p2006_p10 }
  0x28   : > { %p2014_p2 = pnand %p2013_p0, %p2007_p11 }
  0x2a   : > { %2017 = shalt.err (!%p2014_p2)
}
  0x2b   : > { %s2771_s27 = smov 128   ;;  %s2772_s30 = smov 8  }
  0x2c   : > { %s2796_s2 = sld [smem:[#allocation27_spill]]  ;;  %s2029_s8 = scalar_lea.vmem %s323_s11, 512 }
  0x2d   : > { %p2030_p3 = scmp.ne.s32.totalorder %s323_s11, %s2029_s8  ;;  %p2037_p10 = scmp.lt.s32.totalorder %s323_s11, %s323_s11 }
  0x2e   : > { %p2038_p11 = scmp.lt.s32.totalorder %s2029_s8, %s2029_s8 }
  0x2f   : > { %p2032_p6 = pnand %p2030_p3, %p1994_p8 }
  0x30   : > { %p2039_p12 = por %p2038_p11, %p2037_p10 }
  0x31   : > { %p2033_p9 = pneg %p2032_p6 }
  0x32   : > { %1843 = dma.hbm_to_vmem [thread:$0]  (!%p2409_p7), %s2796_s2, 512, %s310_s28, [#allocation8], %s2771_s27, %s2771_s27, %s2772_s30  }
  0x33   : > { %p2040_p13 = pnand %p2039_p12, %p2033_p9 }
  0x35   : > { %2043 = shalt.err (!%p2040_p13)
}
  0x36   : > { %s2797_s3 = sld [smem:[#allocation28_spill]]  ;;  %s2055_s9 = scalar_lea.vmem %s342_s13, 512 }
  0x37   : > { %p2056_p0 = scmp.ne.s32.totalorder %s342_s13, %s2055_s9  ;;  %p2063_p6 = scmp.lt.s32.totalorder %s342_s13, %s342_s13 }
  0x38   : > { %p2064_p9 = scmp.lt.s32.totalorder %s2055_s9, %s2055_s9 }
  0x39   : > { %p2058_p2 = pnand %p2056_p0, %p1994_p8 }
  0x3a   : > { %p2065_p10 = por %p2064_p9, %p2063_p6 }
  0x3b   : > { %p2059_p3 = pneg %p2058_p2 }
  0x3c   : > { %1846 = dma.hbm_to_vmem [thread:$0]  (!%p2409_p7), %s2797_s3, 512, %s323_s11, [#allocation11], %s2771_s27, %s2771_s27, %s2772_s30  }
  0x3d   : > { %p2066_p11 = pnand %p2065_p10, %p2059_p3 }
  0x3f   : > { %2069 = shalt.err (!%p2066_p11)
}
  0x40   : > { %s2798_s6 = sld [smem:[#allocation31_spill]]  ;;  %s1642_s28 = sadd.s32 4294967294, %s2258_s23  }
  0x41   : > { %s39_s29 = sadd.s32 1, %s2250_s21  ;;  %s42_s11 = sadd.s32 1, %s2254_s22 }
  0x42   : > { %p40_p8 = scmp.ge.s32.totalorder %s39_s29, 2  ;;  %s51_s12 = sadd.s32 1, %s2238_s18 }
  0x43   : > { %p58_p12 = scmp.ne.s32.totalorder %s2238_s18, %s2234_s17  ;;  %p59_p13 = scmp.eq.s32.totalorder %s2258_s23, 0 }
  0x44   : > { %s2843_s29 = smov (%p40_p8, %s39_s29), 0  ;;  %s2845_s11 = smov (!%p40_p8, %s42_s11), %s2254_s22 }
  0x45   : > { %2799 = sst [smem:[#allocation21_spill]] %s2843_s29  ;;  %p44_p0 = scmp.ge.s32.totalorder %s2845_s11, 2 }
  0x46   : > { %1849 = dma.hbm_to_vmem [thread:$0]  (!%p2409_p7), %s2798_s6, 512, %s342_s13, [#allocation11], %s2771_s27, %s2771_s27, %s2772_s30  }
  0x47   : > { %s47_s13 = ssub.s32 %s2250_s21, %s2843_s29  ;;  %p2463_p7 = por %p59_p13, %p58_p12 }
  0x48   : > { %p64_p2 = scmp.ne.s32.totalorder %s2234_s17, %s2230_s16  ;;  %s77_s9 = sadd.s32 1, %s2226_s15 }
  0x49   : > { %p84_p3 = scmp.ne.s32.totalorder %s2226_s15, %s2222_s14  ;;  %s2847_s11 = smov (%p44_p0, %s2845_s11), 0 }
  0x4a   : > { %2801 = sst [smem:[#allocation22_spill]] %s2847_s11  ;;  %p2479_p6 = por %p2775_p1, %p64_p2 }
  0x4b   : > { %p2483_p9 = por %p84_p3, %p59_p13  ;;  %s46_s27 = ssub.s32 %s2254_s22, %s2847_s11 }
  0x4c   : > { %p284_p10 = scmp.eq.s32.totalorder %s2389_s24, 3  ;;  %s48_s30 = sor.u32 %s47_s13, %s46_s27 }
  0x4d   : > { %p75_p11 = scmp.eq.s32.totalorder %s46_s27, 0  ;;  %p49_p8 = scmp.eq.s32.totalorder %s48_s30, 0 }
  0x4e   : > { %p2493_p0 = por %p284_p10, %p58_p12  ;;  %p290_p13 = scmp.eq.s32.totalorder %s1642_s28, 3 }
  0x4f   : > { %s2498_s3 = scalar_select %p75_p11, %s2226_s15, %s77_s9  }
  0x50   : > { %s2804_s2 = scalar_select %p2493_p0, 1, 0 }
  0x51   : > { %2806 = sst [smem:[#allocation24_spill]] %s2498_s3  ;;  %p1864_p3 = scmp.lt.s32.totalorder %s2258_s23, 4 }
  0x52   : > { %2805 = sst [smem:[#allocation23_spill]] %s2804_s2  ;;  %s364_s29 = sand.u32 1, %s2238_s18  }
  0x53   : > { %s2501_s6 = scalar_select %p49_p8, %s2238_s18, %s51_s12  }
  0x54   : > { %s1649_s11 = sshll.u32 %s2254_s22, 1  ;;  %p2509_p1 = por %p290_p13, %p64_p2 }
  0x55   : > { %2807 = sst [smem:[#allocation25_spill]] %s2501_s6  ;;  %s1648_s30 = sshll.u32 %s364_s29, 3 }
  0x56   : > { %s2808_s27 = scalar_select %p2509_p1, 1, 0 }
  0x57   : > { %s373_s13 = sadd.s32 %s2250_s21, %s1649_s11  ;;  %s2809_s0 = sld [smem:[#allocation26_spill]] }
  0x58   : > { %s1650_s7 = sshll.u32 %s373_s13, 7  ;;  %s368_s3 = scalar_lea.vmem [#allocation4], %s1648_s30 }
  0x59   : > { %s377_s5 = sshll.u32 %s368_s3, 4  ;;  %p2519_p12 = pnand %p1864_p3, %p2463_p7  ;;  %s378_s5 = int_to_ptr.vmem [resolvable:$true] %s377_s5 }
  0x5a   : > { %p2525_p2 = pnand %p1864_p3, %p2483_p9  ;;  %s384_s11 = sand.u32 1, %s2258_s23  }
  0x5b   : > { %s365_s13 = scalar_lea.sflag [#allocation5], %s364_s29  ;;  %p2072_p10 = pneg %p2519_p12 }
  0x5c   : > { %s2083_s2 = scalar_lea.vmem %s378_s5, 128  ;;  %s2265_s3 = smov [#allocation4]  }
  0x5d   : > { %s375_s9 = scalar_lea.hbm %s2809_s0, %s1650_s7  ;;  %p2084_p11 = scmp.ne.s32.totalorder %s378_s5, %s2083_s2 }
  0x5e   : > { %s2088_s4 = sshll.u32 %s2265_s3, 4  ;;  %s2089_s4 = int_to_ptr.vmem [resolvable:$false] %s2088_s4 }
  0x5f   : > { %p2086_p8 = pnand %p2084_p11, %p2072_p10  ;;  %s2090_s7 = scalar_lea.vmem %s2089_s4, 256 }
  0x60   : > { %p2091_p7 = scmp.lt.s32.totalorder %s378_s5, %s2089_s4  ;;  %p2092_p1 = scmp.lt.s32.totalorder %s2090_s7, %s2083_s2 }
  0x61   : > { %p2087_p13 = pneg %p2086_p8 }
  0x62   : > { %p2093_p0 = por %p2092_p1, %p2091_p7 }
  0x64   : > { %p2094_p4 = pnand %p2093_p0, %p2087_p13 }
  0x66   : > { %2097 = shalt.err (!%p2094_p4)
}
  0x67   : > { %1853 = dma.hbm_to_vmem [thread:$0]  (!%p2519_p12), %s375_s9, 128, %s378_s5, %s365_s13  }
  0x68   : > { %s386_s29 = sand.u32 1, %s2226_s15   ;;  %s1692_s20 = sshll.u32 %s2254_s22, 8 }
  0x69   : > { %s1651_s10 = sshll.u32 %s386_s29, 4  ;;  %s394_s3 = scalar_lea.hbm %s2760_s1, %s1692_s20 }
  0x6a   : > { %s388_s21 = scalar_lea.vmem [#allocation7], %s1651_s10  ;;  %s385_s2 = scalar_lea.sflag [#allocation8], %s384_s11 }
  0x6b   : > { %s395_s6 = sshll.u32 %s388_s21, 4  ;;  %p2100_p1 = pneg %p2525_p2  ;;  %s396_s6 = int_to_ptr.vmem [resolvable:$true] %s395_s6 }
  0x6c   : > { %s2111_s4 = scalar_lea.vmem %s396_s6, 256  ;;  %s2266_s28 = smov [#allocation7]  }
  0x6d   : > { %p2112_p4 = scmp.ne.s32.totalorder %s396_s6, %s2111_s4  ;;  %s2116_s7 = sshll.u32 %s2266_s28, 4  ;;  %s2117_s7 = int_to_ptr.vmem [resolvable:$false] %s2116_s7 }
  0x6e   : > { %s2118_s5 = scalar_lea.vmem %s2117_s7, 512  ;;  %p2119_p3 = scmp.lt.s32.totalorder %s396_s6, %s2117_s7 }
  0x6f   : > { %p2114_p9 = pnand %p2112_p4, %p2100_p1  ;;  %p2120_p12 = scmp.lt.s32.totalorder %s2118_s5, %s2111_s4 }
  0x71   : > { %p2115_p0 = pneg %p2114_p9  ;;  %p2121_p10 = por %p2120_p12, %p2119_p3 }
  0x73   : > { %p2122_p11 = pnand %p2121_p10, %p2115_p0 }
  0x75   : > { %2125 = shalt.err (!%p2122_p11)
}
  0x76   : > { %s2812_s0 = smov 8   ;;  %s2813_s21 = smov 128  }
  0x77   : > { %1856 = dma.hbm_to_vmem [thread:$0]  (!%p2525_p2), %s394_s3, 256, %s396_s6, %s385_s2, %s2813_s21, %s2813_s21, %s2812_s0  }
  0x78   : > { %407 = sbr.rel (%p2401_p5) target bundleno = 2817 (0xb01), region = 60  ;;  %s2549_s9 = sand.u32 (!%p2401_p5), 1, %s2234_s17  }
  0x79   : > { %s1655_s11 = sshll.u32 (!%p2401_p5), %s2549_s9, 3  ;;  %s410_s13 = scalar_lea.sflag (!%p2401_p5), [#allocation5], %s2549_s9 }
  0x7a   : > { %s2553_s29 = scalar_lea.vmem (!%p2401_p5), [#allocation4], %s1655_s11 }
  0x7d   : > { %2197 = dma.done.wait (%p2479_p6), %s410_s13, 128  }
  0x7e   : > { %2199 = vsyncadd (%p2479_p6), %s410_s13, 4294967168  ;;  %s418_s6 = sand.u32 1, %s2389_s24   ;;  %s420_s26 = sand.u32 1, %s2222_s14  }
  0x7f   : > { %s1656_s12 = sshll.u32 %s420_s26, 4  ;;  %s419_s10 = scalar_lea.sflag [#allocation8], %s418_s6 }
  0x80   : > { %s422_s20 = scalar_lea.vmem [#allocation7], %s1656_s12  ;;  %p2814_p5 = scmp.ne.s32.totalorder %s2793_s25, 0 }
  0x82   : > { %2201 = dma.done.wait (%p2814_p5), %s419_s10, 256  }
  0x83   : > { %2203 = vsyncadd (%p2814_p5), %s419_s10, 4294967040  ;;  %p2815_p2 = scmp.eq.s32.totalorder %s2389_s24, 0 }
  0x85   : > { %2205 = dma.done.wait (%p2815_p2), [#allocation8], 512   ;;  %p2816_p8 = pmov %p2815_p2 }
  0x86   : > { %p2817_p6 = pmov %p2815_p2 }
  0x87   : > { %2207 = vsyncadd (%p2816_p8), [#allocation8], 4294966784 }
  0x88   : > { %2209 = dma.done.wait (%p2817_p6), [#allocation11], 1024   ;;  %p2818_p13 = pmov %p2815_p2 }
  0x89   : > { %s2573_s8 = scalar_lea.vmem [#allocation13], %s1655_s11  ;;  %p1661_p7 = scmp.ne.s32.totalorder %s2242_s19, 0 }
  0x8a   : > { %2211 = vsyncadd (%p2818_p13), [#allocation11], 4294966272  ;;  %s2819_s30 = sld [smem:[#allocation30_spill]] (!%p1661_p7) }
  0x8b   : > { %479 = sbr.rel (%p1661_p7) target bundleno = 351 (0x15f), region = 84 }
  0x90   : > { %v485_v0 = vld [vmem:[#allocation10 + $0x18] sm:$0xff]  ;;  %v484_v1 = vld [vmem:[#allocation10 + $0x10] sm:$0xff]  ;;  %vm493_vm0 = vcmask 261120   ;;  %v483_v3 = vld [vmem:[#allocation10 + $0x8] sm:$0xff]  ;;  %vm575_vm1 = vcmask 523264  }
  0x91   : > { %1733 = vmatprep.subr.mxu0 %v485_v0  ;;  %v480_v2 = vld [vmem:[%s422_s20] sm:$0xff]  ;;  %v481_v5 = vld [vmem:[%s422_s20 + $0x8] sm:$0xff] }
  0x92   : > { %1734 = vmatpush3.msra.mxu0 %v485_v0  ;;  %1741 = vmatprep.mubr.msk.f32.mxu0 %vm493_vm0, %v480_v2  ;;  %v482_v4 = vld [vmem:[#allocation10] sm:$0xff]  ;;  %v1662_v6 = vld [vmem:[%s2819_s30] ss:$0 sm:$0xff] }
  0x93   : > { %1735 = vmatprep.subr.mxu0 %v484_v1 }
  0x94   : > { %1736 = vmatpush3.msra.mxu0 %v484_v1 }
  0x95   : > { %1737 = vmatprep.subr.mxu0 %v483_v3 }
  0x96   : > { %1738 = vmatpush3.msra.mxu0 %v483_v3 }
  0x97   : > { %1739 = vmatprep.subr.mxu0 %v482_v4 }
  0x98   : > { %1740 = vmatpush3.msra.mxu0 %v482_v4 }
  0x99   : > { %1742 = vmatmul.mubr.msk.f32.vlgmr.msra.gmra.mxu0 %vm493_vm0, %v481_v5 }
 0x159   : > { %v1743_v7 = vpop.f32.mrf.mxu0 }
 0x15a   : > { %v572_v8 = vadd.f32 %v1743_v7, %v1662_v6 }
 0x15b   : > { %v566_v9 = vpop.f32.mrf.mxu0 }
 0x15c   : > { %577 = vst.msk [vmem:[#allocation2 + $0x8] sm:$0xff] %vm575_vm1, %v572_v8  ;;  %v567_v10 = vadd.f32 %v1662_v6, %v566_v9 }
 0x15e   : > { %576 = vst.msk [vmem:[#allocation2] sm:$0xff] %vm575_vm1, %v567_v10 }
 0x15f PF: > { %v582_v11 = vld [vmem:[#allocation9 + $0x18] sm:$0xff]  ;;  %v2267_v12 = vmov 0.0   ;;  %v581_v13 = vld [vmem:[#allocation9 + $0x10] sm:$0xff]  ;;  %vm2268_vm2 = vmmov 0   ;;  %vm667_vm3 = vcmask 64512   ;;  %s2269_s3 = smov 96  }
 0x160   : > { %1744 = vmatprep.subr.mxu0 %v2267_v12  ;;  %1752 = vmatprep.mubr.msk.f32.mxu0 %vm2268_vm2, %v2267_v12  ;;  %v580_v16 = vld [vmem:[#allocation9 + $0x8] sm:$0xff]  ;;  %v579_v17 = vld [vmem:[#allocation9] sm:$0xff]  ;;  %v2595_v18 = vld [vmem:[%s2553_s29] sm:$0xff]  ;;  %vm590_vm4 = vcmask 261120   ;;  %s2270_s2 = smov 120   ;;  %s2820_s7 = sld [smem:[#allocation29_spill]] }
 0x161   : > { %1745 = vmatpush3.msra.mxu0 %v582_v11  ;;  %1755 = vmatprep.subr.mxu1 %v2267_v12  ;;  %vm747_vm5 = vcmask 130048   ;;  %s2271_s5 = smov 88   ;;  %s2272_s0 = smov 112   ;;  %vm1015_vm6 = vcmask 130112   ;;  %vm1193_vm7 = vcmask 195712   ;;  %vm1371_vm8 = vcmask 261312  }
 0x162   : > { %1746 = vmatprep.subr.mxu0 %v2267_v12  ;;  %1759 = vmatprep.mubr.msk.f32.mxu1 %vm2268_vm2, %v2267_v12  ;;  %s2273_s21 = smov 80   ;;  %s2274_s11 = smov 104  }
 0x163   : > { %v2586_v15 = vld [vmem:[#allocation2 + $0x8] sm:$0xff]  ;;  %1747 = vmatpush3.msra.mxu0 %v581_v13  ;;  %s2275_s13 = smov 72   ;;  %s2276_s29 = smov 16  }
 0x164   : > { %1756 = vmatpush3.xpose.msk.msra.mxu1 %vm667_vm3, %v2586_v15  ;;  %1748 = vmatprep.subr.mxu0 %v2267_v12  ;;  %s2277_s6 = smov 8   ;;  %s2278_s26 = smov 24  }
 0x165   : > { %v2582_v14 = vld [vmem:[#allocation2] sm:$0xff]  ;;  %1757 = vmatprep.subr.mxu1 %v2267_v12  ;;  %1749 = vmatpush3.msra.mxu0 %v580_v16  ;;  %s2821_s20 = sld [smem:[#allocation32_spill]]  ;;  %s2279_s10 = smov [#allocation13]  }
 0x166   : > { %757 = vrot.lane.b32.xlu1 %v2582_v14, %s2269_s3  ;;  %1750 = vmatprep.subr.mxu0 %v2267_v12  ;;  %v1665_v19 = vld [vmem:[%s2820_s7] ss:$0 sm:$0xff]  ;;  %s2822_s24 = sld [smem:[#allocation19_spill]] }
 0x167   : > { %1751 = vmatpush3.msra.mxu0 %v579_v17  ;;  %s2823_s30 = sld [smem:[#allocation23_spill]] }
 0x168   : > { %1758 = vmatpush3.xpose.msk.msra.mxu1 %vm667_vm3, %v2582_v14  ;;  %1753 = vmatmul.mubr.msk.f32.vlgmr.msra.gmra.mxu0 %vm590_vm4, %v2595_v18  ;;  %s2824_s28 = sld [smem:[#allocation33_spill]] }
 0x169   : > { %1762 = vmatprep.subr.mxu1 %v2267_v12  ;;  %1776 = vmatprep.subr.mxu0 %v2267_v12 }
 0x16a   : > { %843 = vrot.lane.b32.xlu1 %v2586_v15, %s2270_s2  ;;  %1780 = vmatprep.mubr.msk.f32.mxu0 %vm2268_vm2, %v2267_v12 }
 0x16c   : > { %s1688_s25 = sshll.u32 %s2822_s24, 1 }
 0x16d   : > { %p2827_p4 = scmp.ne.s32.totalorder %s2823_s30, 0 }
 0x16e   : > { %841 = vrot.lane.b32.xlu1 %v2582_v14, %s2270_s2 }
 0x1d8   : > { %v758_v31 = vpop.permute.xlu1 %757 }
 0x1dc   : > { %v844_v34 = vpop.permute.xlu1 %843 }
 0x1e0   : > { %v842_v36 = vpop.permute.xlu1 %841 }
 0x228   : > { %v660_v20 = vpop.f32.mrf.mxu0 }
 0x229   : > { %v661_v21 = vadd.f32 %v1665_v19, %v660_v20 }
 0x22a   : > { %v1754_v22 = vpop.f32.mrf.mxu0 }
 0x22b   : > { %v664_v23 = vmul.f32 0.35355338, %v661_v21 }
 0x22d   : > { %839 = vrot.lane.b32.xlu1 %v664_v23, %s2270_s2  ;;  %1760 = vmatmul.mubr.msk.f32.vlgmr.msra.gmra.mxu1 %vm667_vm3, %v664_v23 }
 0x22e   : > { %1766 = vmatprep.mubr.msk.f32.mxu1 %vm2268_vm2, %v2267_v12 }
 0x29f   : > { %v840_v37 = vpop.permute.xlu1 %839 }
 0x2ed   : > { %v743_v24 = vpop.f32.mrf.mxu1 }
 0x2ee   : > { %v748_v25 = vsel %vm747_vm5, %v743_v24, -inf }
 0x2ef   : > { %749 = vmax.xlane.f32.xlu0 %v748_v25  ;;  %v1761_v26 = vpop.f32.mrf.mxu1 }
 0x305   : > { %759 = vrot.lane.b32.xlu0 %v2586_v15, %s2269_s3  ;;  %s1501_s3 = sadd.s32 %s2242_s19, %s1688_s25  ;;  %s1490_s19 = scalar_lea.sflag [#allocation6], %s2549_s9 }
 0x309   : > { %932 = vrot.lane.b32.xlu0 %v2586_v15, %s2271_s5 }
 0x30d   : > { %930 = vrot.lane.b32.xlu0 %v2582_v14, %s2271_s5 }
 0x311   : > { %1021 = vrot.lane.b32.xlu0 %v2586_v15, %s2272_s0 }
 0x315   : > { %1019 = vrot.lane.b32.xlu0 %v2582_v14, %s2272_s0 }
 0x319   : > { %1017 = vrot.lane.b32.xlu0 %v664_v23, %s2272_s0  ;;  %s2825_s0 = sld [smem:[#allocation34_spill]] }
 0x378   : > { %v750_v27 = vpop.xlane.xlu0 %749 }
 0x379   : > { %v751_v28 = vsub.f32 %v743_v24, %v750_v27 }
 0x37b   : > { %v752_v29 = vmul.f32 1.442695, %v751_v28 }
 0x37c   : > { %v760_v30 = vpop.permute.xlu0 %759 }
 0x37d   : > { %1974 = vpow2.f32 %v752_v29  ;;  %1763 = vmatpush3.msra.mxu1 %v760_v30  ;;  %v1377_v29 = vld [vmem:[#allocation12 + $0x18] sm:$0xff]  ;;  %v1376_v30 = vld [vmem:[#allocation12 + $0x10] sm:$0xff] }
 0x37e   : > { %1764 = vmatprep.subr.mxu1 %v2267_v12 }
 0x37f   : > { %1765 = vmatpush3.msra.mxu1 %v758_v31  ;;  %v1375_v31 = vld [vmem:[#allocation12 + $0x8] sm:$0xff] }
 0x380   : > { %v933_v32 = vpop.permute.xlu0 %932  ;;  %1769 = vmatprep.subr.mxu1 %v2267_v12 }
 0x381   : > { %1777 = vmatpush3.msra.mxu0 %v933_v32  ;;  %v1374_v32 = vld [vmem:[#allocation12] sm:$0xff] }
 0x382   : > { %1778 = vmatprep.subr.mxu0 %v2267_v12 }
 0x384   : > { %v931_v33 = vpop.permute.xlu0 %930 }
 0x385   : > { %1779 = vmatpush3.msra.mxu0 %v931_v33 }
 0x386   : > { %1783 = vmatprep.subr.mxu0 %v2267_v12 }
 0x388   : > { %v1022_v48 = vpop.permute.xlu0 %1021 }
 0x38a   : > { %v2627_v35 = vpop.eup %1974 }
 0x38b   : > { %1767 = vmatmul.mubr.msk.f32.vlgmr.msra.gmra.mxu1 %vm747_vm5, %v2627_v35  ;;  %v754_v20 = vsel %vm747_vm5, %v2627_v35, 0.0 }
 0x38c   : > { %1770 = vmatpush3.xpose.msk.msra.mxu1 %vm667_vm3, %v844_v34  ;;  %1773 = vmatprep.mubr.msk.f32.mxu1 %vm2268_vm2, %v2267_v12  ;;  %v1020_v50 = vpop.permute.xlu0 %1019 }
 0x38d   : > { %1771 = vmatprep.subr.mxu1 %v2267_v12 }
 0x390   : > { %1772 = vmatpush3.xpose.msk.msra.mxu1 %vm667_vm3, %v842_v36  ;;  %v1018_v51 = vpop.permute.xlu0 %1017 }
 0x391   : > { %1790 = vmatprep.subr.mxu1 %v2267_v12 }
 0x393   : > { %1774 = vmatmul.mubr.msk.f32.vlgmr.msra.gmra.mxu1 %vm667_vm3, %v840_v37 }
 0x394   : > { %1794 = vmatprep.mubr.msk.f32.mxu1 %vm2268_vm2, %v2267_v12 }
 0x44b   : > { %v2640_v38 = vpop.f32.mrf.mxu1 }
 0x44d   : > { %v1768_v39 = vpop.f32.mrf.mxu1 }
 0x44e   : > { %v1683_v39 = vld [vmem:[%s2821_s20] ss:$0 sm:$0xff]  ;;  %s2130_s20 = sshll.u32 %s2279_s10, 4  ;;  %s2131_s20 = int_to_ptr.vmem [resolvable:$false] %s2130_s20 }
 0x44f   : > { %s2132_s24 = scalar_lea.vmem %s2131_s20, 256 }
 0x453   : > { %v917_v40 = vpop.f32.mrf.mxu1 }
 0x454   : > { %v921_v41 = vsel %vm747_vm5, %v917_v40, -inf }
 0x455   : > { %922 = vmax.xlane.f32.xlu1 %v921_v41  ;;  %v1775_v42 = vpop.f32.mrf.mxu1 }
 0x466   : > { %1110 = vrot.lane.b32.xlu1 %v2586_v15, %s2273_s21 }
 0x46a   : > { %1108 = vrot.lane.b32.xlu1 %v2582_v14, %s2273_s21  ;;  %s1689_s21 = sshll.u32 %s1501_s3, 7 }
 0x46e   : > { %1199 = vrot.lane.b32.xlu1 %v2586_v15, %s2274_s11 }
 0x472   : > { %1195 = vrot.lane.b32.xlu1 %v664_v23, %s2274_s11 }
 0x4de   : > { %v923_v43 = vpop.xlane.xlu1 %922 }
 0x4df   : > { %v924_v44 = vsub.f32 %v917_v40, %v923_v43 }
 0x4e1   : > { %v925_v45 = vmul.f32 1.442695, %v924_v44 }
 0x4e2   : > { %v1111_v46 = vpop.permute.xlu1 %1110 }
 0x4e3   : > { %1976 = vpow2.f32 %v925_v45  ;;  %1791 = vmatpush3.msra.mxu1 %v1111_v46 }
 0x4e4   : > { %1792 = vmatprep.subr.mxu1 %v2267_v12 }
 0x4e6   : > { %v1109_v47 = vpop.permute.xlu1 %1108 }
 0x4e7   : > { %1793 = vmatpush3.msra.mxu1 %v1109_v47 }
 0x4e8   : > { %1797 = vmatprep.subr.mxu1 %v2267_v12 }
 0x4ea   : > { %v1200_v1 = vpop.permute.xlu1 %1199 }
 0x4ee   : > { %v1196_v2 = vpop.permute.xlu1 %1195 }
 0x4f0   : > { %v1977_v49 = vpop.eup %1976 }
 0x4f1   : > { %1781 = vmatmul.mubr.msk.f32.vlgmr.msra.gmra.mxu0 %vm747_vm5, %v1977_v49  ;;  %v927_v57 = vsel %vm747_vm5, %v1977_v49, 0.0 }
 0x4f2   : > { %1784 = vmatpush3.xpose.msk.msra.mxu0 %vm667_vm3, %v1022_v48  ;;  %1787 = vmatprep.mubr.msk.f32.mxu0 %vm2268_vm2, %v2267_v12 }
 0x4f3   : > { %1785 = vmatprep.subr.mxu0 %v2267_v12 }
 0x4f6   : > { %1786 = vmatpush3.xpose.msk.msra.mxu0 %vm667_vm3, %v1020_v50 }
 0x4f7   : > { %1804 = vmatprep.subr.mxu0 %v2267_v12 }
 0x4f9   : > { %1788 = vmatmul.mubr.msk.f32.vlgmr.msra.gmra.mxu0 %vm667_vm3, %v1018_v51 }
 0x4fa   : > { %1808 = vmatprep.mubr.msk.f32.mxu0 %vm2268_vm2, %v2267_v12 }
 0x5b1   : > { %v1005_v52 = vpop.f32.mrf.mxu0 }
 0x5b3   : > { %v1782_v53 = vpop.f32.mrf.mxu0 }
 0x5b9   : > { %v1095_v54 = vpop.f32.mrf.mxu0 }
 0x5ba   : > { %v1099_v55 = vsel %vm747_vm5, %v1095_v54, -inf }
 0x5bb   : > { %1100 = vmax.xlane.f32.xlu0 %v1099_v55  ;;  %v1789_v56 = vpop.f32.mrf.mxu0 }
 0x5d1   : > { %1197 = vrot.lane.b32.xlu0 %v2582_v14, %s2274_s11  ;;  %s1505_s11 = sshll.u32 %s2573_s8, 4  ;;  %s1506_s11 = int_to_ptr.vmem [resolvable:$true] %s1505_s11 }
 0x5d2   : > { %s2126_s12 = scalar_lea.vmem %s1506_s11, 128  ;;  %p2133_p3 = scmp.lt.s32.totalorder %s1506_s11, %s2131_s20 }
 0x5d3   : > { %p2127_p1 = scmp.ne.s32.totalorder %s1506_s11, %s2126_s12  ;;  %p2134_p12 = scmp.lt.s32.totalorder %s2132_s24, %s2126_s12 }
 0x5d5   : > { %1288 = vrot.lane.b32.xlu0 %v2586_v15, %s2275_s13  ;;  %p2128_p9 = pnand %p2127_p1, %p2827_p4  ;;  %p2135_p10 = por %p2134_p12, %p2133_p3 }
 0x5d7   : > { %p2129_p0 = pneg %p2128_p9 }
 0x5d9   : > { %1286 = vrot.lane.b32.xlu0 %v2582_v14, %s2275_s13  ;;  %p2136_p11 = pnand %p2135_p10, %p2129_p0 }
 0x5f8   : > { %928 = vadd.xlane.f32.xlu0 %v927_v57 }
 0x644   : > { %v1101_v58 = vpop.xlane.xlu0 %1100 }
 0x645   : > { %v1102_v59 = vsub.f32 %v1095_v54, %v1101_v58  ;;  %v1686_v54 = vld [vmem:[%s2825_s0] ss:$0 sm:$0xff] }
 0x647   : > { %v1103_v60 = vmul.f32 1.442695, %v1102_v59 }
 0x648   : > { %v1198_v61 = vpop.permute.xlu0 %1197 }
 0x649   : > { %1978 = vpow2.f32 %v1103_v60 }
 0x64c   : > { %v1289_v62 = vpop.permute.xlu0 %1288 }
 0x64d   : > { %1805 = vmatpush3.msra.mxu0 %v1289_v62 }
 0x64e   : > { %1806 = vmatprep.subr.mxu0 %v2267_v12 }
 0x650   : > { %v1287_v63 = vpop.permute.xlu0 %1286 }
 0x651   : > { %1807 = vmatpush3.msra.mxu0 %v1287_v63 }
 0x652   : > { %1811 = vmatprep.subr.mxu0 %v2267_v12 }
 0x656   : > { %v1979_v0 = vpop.eup %1978 }
 0x657   : > { %1795 = vmatmul.mubr.msk.f32.vlgmr.msra.gmra.mxu1 %vm747_vm5, %v1979_v0  ;;  %v1105_v8 = vsel %vm747_vm5, %v1979_v0, 0.0 }
 0x658   : > { %1798 = vmatpush3.xpose.msk.msra.mxu1 %vm667_vm3, %v1200_v1  ;;  %1801 = vmatprep.mubr.msk.f32.mxu1 %vm2268_vm2, %v2267_v12 }
 0x659   : > { %1799 = vmatprep.subr.mxu1 %v2267_v12 }
 0x65c   : > { %1800 = vmatpush3.xpose.msk.msra.mxu1 %vm667_vm3, %v1198_v61 }
 0x65f   : > { %1802 = vmatmul.mubr.msk.f32.vlgmr.msra.gmra.mxu1 %vm667_vm3, %v1196_v2 }
 0x681   : > { %v929_v17 = vpop.xlane.xlu0 %928 }
 0x717   : > { %v1183_v3 = vpop.f32.mrf.mxu1 }
 0x719   : > { %v1796_v4 = vpop.f32.mrf.mxu1 }
 0x71f   : > { %v1273_v5 = vpop.f32.mrf.mxu1 }
 0x720   : > { %v1277_v6 = vsel %vm747_vm5, %v1273_v5, -inf }
 0x721   : > { %1278 = vmax.xlane.f32.xlu1 %v1277_v6  ;;  %v1803_v7 = vpop.f32.mrf.mxu1 }
 0x725   : > { %1106 = vadd.xlane.f32.xlu1 %v1105_v8 }
 0x7aa   : > { %v1279_v9 = vpop.xlane.xlu1 %1278 }
 0x7ab   : > { %v1280_v10 = vsub.f32 %v1273_v5, %v1279_v9 }
 0x7ad   : > { %v1281_v11 = vmul.f32 1.442695, %v1280_v10 }
 0x7ae   : > { %v1107_v13 = vpop.xlane.xlu1 %1106 }
 0x7af   : > { %1980 = vpow2.f32 %v1281_v11 }
 0x7b0   : > { %1982 = vrcp.f32 %v1107_v13 }
 0x7b1   : > { %1984 = vrcp.f32 %v929_v17 }
 0x7bc   : > { %v1981_v14 = vpop.eup %1980 }
 0x7bd   : > { %v1983_v15 = vpop.eup %1982  ;;  %1809 = vmatmul.mubr.msk.f32.vlgmr.msra.gmra.mxu0 %vm747_vm5, %v1981_v14  ;;  %v1283_v16 = vsel %vm747_vm5, %v1981_v14, 0.0 }
 0x7be   : > { %1284 = vadd.xlane.f32.xlu1 %v1283_v16  ;;  %v1188_v19 = vmul.f32 %v1983_v15, %v1183_v3  ;;  %1819 = vmatprep.mubr.msk.f32.mxu0 %vm2268_vm2, %v2267_v12  ;;  %v1985_v21 = vpop.eup %1984 }
 0x7bf   : > { %v1010_v22 = vmul.f32 %v1985_v21, %v1005_v52  ;;  %1812 = vmatpush3.msra.mxu0 %v1377_v29  ;;  %v1685_v52 = vld [vmem:[%s2824_s28] ss:$0 sm:$0xff] }
 0x7c0   : > { %1190 = vrot.lane.b32.xlu0 %v1188_v19, %s2276_s29  ;;  %1813 = vmatprep.subr.mxu0 %v2267_v12 }
 0x7c1   : > { %1814 = vmatpush3.msra.mxu0 %v1376_v30 }
 0x7c2   : > { %755 = vadd.xlane.f32.xlu1 %v754_v20  ;;  %1815 = vmatprep.subr.mxu0 %v2267_v12 }
 0x7c3   : > { %1816 = vmatpush3.msra.mxu0 %v1375_v31 }
 0x7c4   : > { %1817 = vmatprep.subr.mxu0 %v2267_v12 }
 0x7c5   : > { %1818 = vmatpush3.msra.mxu0 %v1374_v32 }
 0x7d3   : > { %1012 = vrot.lane.b32.xlu1 %v1010_v22, %s2277_s6  ;;  %s2826_s6 = sld [smem:[#allocation35_spill]] }
 0x832   : > { %v1191_v28 = vpop.permute.xlu0 %1190 }
 0x847   : > { %v1285_v23 = vpop.xlane.xlu1 %1284 }
 0x84b   : > { %v756_v24 = vpop.xlane.xlu1 %755 }
 0x84c   : > { %1986 = vrcp.f32 %v756_v24 }
 0x84d   : > { %1988 = vrcp.f32 %v1285_v23 }
 0x84f   : > { %v1013_v27 = vpop.permute.xlu1 %1012 }
 0x859   : > { %v1987_v25 = vpop.eup %1986 }
 0x85a   : > { %v837_v26 = vmul.f32 %v1987_v25, %v2640_v38  ;;  %v1989_v33 = vpop.eup %1988 }
 0x85c   : > { %838 = vst.msk [vmem:[#allocation3] sm:$0xff] %vm667_vm3, %v837_v26 }
 0x85d   : > { %1016 = vst.msk [vmem:[#allocation3] sm:$0xff] %vm1015_vm6, %v1013_v27 }
 0x85e   : > { %1194 = vst.msk [vmem:[#allocation3] sm:$0xff] %vm1193_vm7, %v1191_v28 }
 0x87d   : > { %v1361_v34 = vpop.f32.mrf.mxu0 }
 0x87e   : > { %v1366_v35 = vmul.f32 %v1989_v33, %v1361_v34 }
 0x87f   : > { %v1810_v36 = vpop.f32.mrf.mxu0 }
 0x880   : > { %1368 = vrot.lane.b32.xlu1 %v1366_v35, %s2278_s26  ;;  %s1503_s26 = scalar_lea.hbm %s2826_s6, %s1689_s21 }
 0x8f2   : > { %v1369_v37 = vpop.permute.xlu1 %1368 }
 0x8f3   : > { %1372 = vst.msk [vmem:[#allocation3] sm:$0xff] %vm1371_vm8, %v1369_v37 }
 0x8fa   : > { %v1373_v38 = vld [vmem:[#allocation3] sm:$0xff] }
 0x8fb   : > { %1820 = vmatmul.mubr.msk.f32.vlgmr.msra.gmra.mxu0 %vm590_vm4, %v1373_v38 }
 0x9bb   : > { %v1454_v40 = vpop.f32.mrf.mxu0 }
 0x9bc   : > { %v1455_v12 = vadd.f32 %v1683_v39, %v1454_v40 }
 0x9bd   : > { %v1821_v41 = vpop.f32.mrf.mxu0 }
 0x9be   : > { %v1458_v42 = vadd.f32 %v1455_v12, %v2595_v18 }
 0x9c0   : > { %v1459_v43 = vsel %vm590_vm4, %v1458_v42, 0.0 }
 0x9c1   : > { %1460 = vadd.xlane.f32.xlu1 %v1459_v43 }
 0xa4a   : > { %v1461_v44 = vpop.xlane.xlu1 %1460 }
 0xa4b   : > { %v1462_v45 = vmul.f32 0.03125, %v1461_v44 }
 0xa4d   : > { %v1463_v46 = vsub.f32 %v1458_v42, %v1462_v45 }
 0xa4f   : > { %v1464_v47 = vmul.f32 %v1463_v46, %v1463_v46 }
 0xa51   : > { %v1465_v48 = vsel %vm590_vm4, %v1464_v47, 0.0 }
 0xa52   : > { %1466 = vadd.xlane.f32.xlu0 %v1465_v48 }
 0xadb   : > { %v1467_v49 = vpop.xlane.xlu0 %1466 }
 0xadc   : > { %v1468_v50 = vmul.f32 0.03125, %v1467_v49 }
 0xade   : > { %v1469_v51 = vadd.f32 1e-05, %v1468_v50 }
 0xae0   : > { %1990 = vrsqrt.f32 %v1469_v51 }
 0xaed   : > { %v1991_v18 = vpop.eup %1990 }
 0xaee   : > { %v1471_v53 = vmul.f32 %v1991_v18, %v1463_v46 }
 0xaf0   : > { %v1479_v55 = vmul.f32 %v1685_v52, %v1471_v53 }
 0xaf2   : > { %v1487_v56 = vadd.f32 %v1686_v54, %v1479_v55 }
 0xaf4   : > { %1488 = vst.msk [vmem:[%s2573_s8] sm:$0xff] %vm590_vm4, %v1487_v56 }
 0xaf5   : > { %2139 = shalt.err (!%p2136_p11)
}
 0xaf6   : > { %s2140_s25 = scalar_lea.hbm %s1503_s26, 128  ;;  %s2144_s3 = scalar_lea.hbm %s2826_s6, 512 }
 0xaf7   : > { %p2141_p5 = scmp.ne.s32.totalorder %s1503_s26, %s2140_s25  ;;  %p2145_p6 = scmp.lt.s32.totalorder %s1503_s26, %s2826_s6 }
 0xaf8   : > { %p2146_p13 = scmp.lt.s32.totalorder %s2144_s3, %s2140_s25 }
 0xaf9   : > { %p2142_p2 = pnand %p2141_p5, %p2827_p4 }
 0xafa   : > { %p2147_p7 = por %p2146_p13, %p2145_p6 }
 0xafb   : > { %p2143_p8 = pneg %p2142_p2 }
 0xafd   : > { %p2148_p1 = pnand %p2147_p7, %p2143_p8 }
 0xaff   : > { %2151 = shalt.err (!%p2148_p1)
}
 0xb00   : > { %1838 = dma.vmem_to_hbm [thread:$0]  (%p2827_p4), %s1506_s11, 128, %s1503_s26, %s1490_s19  }
 0xb01 PF: > { %p1868_p9 = scmp.ge.s32.totalorder %s2258_s23, 2  ;;  %s1517_s28 = sand.u32 1, %s2230_s16  }
 0xb02   : > { %p2828_p0 = scmp.ne.s32.totalorder %s2808_s27, 0  ;;  %s1518_s7 = scalar_lea.sflag [#allocation6], %s1517_s28 }
 0xb04   : > { %p1858_p3 = pnand %p1868_p9, %p2828_p0 }
 0xb06   : > { %p1859_p12 = pneg %p1858_p3 }
 0xb08   : > { %2213 = dma.done.wait (%p1859_p12), %s1518_s7, 128  }
 0xb09   : > { %2215 = vsyncadd (%p1859_p12), %s1518_s7, 4294967168  ;;  %s30_s23 = sadd.s32 1, %s2258_s23   ;;  %s2829_s5 = sld [smem:[#allocation24_spill]] }
 0xb0a   : > { %p27_p10 = scmp.ge.s32.totalorder %s30_s23, 6   ;;  %s2830_s30 = sld [smem:[#allocation25_spill]] }
 0xb0b   : > { %s2831_s19 = sld [smem:[#allocation20_spill]]  ;;  %s2834_s13 = smov %s2222_s14 }
 0xb0c   : > { %s2832_s21 = sld [smem:[#allocation21_spill]]  ;;  %s2835_s14 = smov %s2226_s15 }
 0xb0d   : > { %s2833_s0 = sld [smem:[#allocation22_spill]]  ;;  %s2837_s16 = smov %s2234_s17 }
 0xb0e   : > { %s2838_s17 = smov %s2238_s18  ;;  %s2840_s20 = smov %s2254_s22 }
 0xb0f   : > { %s2836_s15 = smov %s2829_s5  ;;  %29 = sbr.rel (!%p27_p10) target bundleno = 23 (0x17), region = 134 }
 0xb10   : > { %s2839_s18 = smov %s2830_s30 }
 0xb13   : > { %s2841_s22 = smov %s2833_s0 }
 0xb14   :  { %1523 = vsyncpa [#allocation5], 1 }
 0xb15   :  { %1525 = vsyncpa [#allocation5 + $0x1], 1 }
 0xb16   :  { %1526 = vsyncpa [#allocation8], 1 }
 0xb17   :  { %1528 = vsyncpa [#allocation8 + $0x1], 1 }
 0xb18   :  { %1529 = vsyncpa [#allocation11], 1 }
 0xb19   :  { %1530 = vsyncpa [#allocation6], 1 }
 0xb1a   :  { %1532 = vsyncpa [#allocation6 + $0x1], 1 }

</bundles_post_ra>
